<compile_context>
chip_gen: v5e
topology: v5e:2x2
jax: 0.10.0
libtpu: 0.0.40
codegen_flags: <defaults>
</compile_context>

<pallas_src>
from functools import partial

import jax
import jax.numpy as jnp
from jax.experimental import pallas as pl
from jax.experimental.pallas import tpu as pltpu


# ----------------------------------------------------------------------------
# Pallas kernel: full TemporalConvNet for `bt` batch elements per grid step.
# ----------------------------------------------------------------------------
def _tcn_kernel(x_ref, w1_ref, b1_ref, w2_ref, b2_ref, wd_ref, bd_ref,
                o_ref, abuf_ref, bbuf_ref, *,
                L, K, Cp, bt, dilations, maxpad, ds_index):
    # x_ref  : (bt, L, Cp)        bf16 channel-padded input (NLC)
    # w1_ref : (nl, K*Cp, Cp)     bf16 folded conv1 weights per layer
    # w2_ref : (nl, K*Cp, Cp)     bf16 folded conv2 weights per layer
    # b1_ref/b2_ref : (nl, 1, Cp) f32 biases
    # wd_ref : (nds, Cp, Cp)      bf16 1x1 downsample weights (only real ones)
    # bd_ref : (nds, 1, Cp)       f32 downsample biases
    # o_ref  : (bt, L, Cp)        f32 output
    # abuf/bbuf : (bt, maxpad+L, Cp) f32 scratch with a causal zero halo

    # Zero the causal halo rows once; scratch persists across grid iterations
    # and the halo is never overwritten afterwards.
    if maxpad > 0:
        @pl.when(pl.program_id(0) == 0)
        def _():
            z = jnp.zeros((bt, maxpad, Cp), jnp.float32)
            abuf_ref[:, pl.ds(0, maxpad), :] = z
            bbuf_ref[:, pl.ds(0, maxpad), :] = z

    # Stage the block input (residual source AND conv1 operand) behind the halo.
    abuf_ref[:, pl.ds(maxpad, L), :] = x_ref[...].astype(jnp.float32)

    def taps(buf_ref, dil, pad):
        # Gather the K causally shifted slices and fold them into one
        # (bt*L, K*Cp) operand; a shorter per-layer pad just means the leading
        # taps read deeper into the (all-zero) halo -> still correct.
        off = maxpad - pad
        parts = [buf_ref[:, pl.ds(off + k * dil, L), :].reshape(bt * L, Cp)
                 for k in range(K)]
        cat = parts[0] if K == 1 else jnp.concatenate(parts, axis=-1)
        return cat.astype(jnp.bfloat16)          # bf16 operands for the MXU

    out = None
    n_layers = len(dilations)
    for li in range(n_layers):                   # small static layer loop
        dil = dilations[li]
        pad = (K - 1) * dil

        # ---- conv1 (causal dilated, taps folded) + bias + ReLU -------------
        h1 = jnp.dot(taps(abuf_ref, dil, pad), w1_ref[li],
                     preferred_element_type=jnp.float32) + b1_ref[li]
        h1 = jnp.maximum(h1, 0.0)
        bbuf_ref[:, pl.ds(maxpad, L), :] = h1.reshape(bt, L, Cp)

        # ---- conv2 (causal dilated) + bias + ReLU ---------------------------
        h2 = jnp.dot(taps(bbuf_ref, dil, pad), w2_ref[li],
                     preferred_element_type=jnp.float32) + b2_ref[li]
        h2 = jnp.maximum(h2, 0.0)

        # ---- residual: identity unless the block changes channel count -----
        x_in = abuf_ref[:, pl.ds(maxpad, L), :].reshape(bt * L, Cp)
        if ds_index[li] is None:
            res = x_in                           # skip the identity matmul
        else:
            j = ds_index[li]
            res = jnp.dot(x_in.astype(jnp.bfloat16), wd_ref[j],
                          preferred_element_type=jnp.float32) + bd_ref[j]

        out = jnp.maximum(h2 + res, 0.0)
        if li + 1 < n_layers:                    # feed the next block
            abuf_ref[:, pl.ds(maxpad, L), :] = out.reshape(bt, L, Cp)

    o_ref[...] = out.reshape(bt, L, Cp).astype(o_ref.dtype)


# ----------------------------------------------------------------------------
# Host-side weight packing helpers
# ----------------------------------------------------------------------------
def _round_up(x, m):
    return (x + m - 1) // m * m


def _fold_taps(w, Cp):
    # (Cout, Cin, K) conv weight -> (K*Cp, Cp) folded, channel-padded matrix.
    cout, cin, K = w.shape
    w_k = jnp.transpose(w, (2, 1, 0))                        # (K, Cin, Cout)
    w_p = jnp.zeros((K, Cp, Cp), jnp.float32).at[:, :cin, :cout].set(w_k)
    return w_p.reshape(K * Cp, Cp)


def _pad_1x1(wd, Cp):
    cout, cin = wd.shape
    return jnp.zeros((Cp, Cp), jnp.float32).at[:cin, :cout].set(wd.T)


def _pad_bias(b, Cp):
    return jnp.zeros((1, Cp), jnp.float32).at[0, :b.shape[0]].set(b)


def _pick_batch_tile(B, L):
    bt = max(1, min(B, 256 // max(L, 1)))
    while B % bt:
        bt -= 1
    return bt


# ----------------------------------------------------------------------------
# Wrapper (NCL in / NCL out, PyTorch convention)
# ----------------------------------------------------------------------------
def temporal_conv_net_forward(x_ncl, layer_params, *, kernel_size):
    """x_ncl: (B, Cin, L).  layer_params: list of (w1, b1, w2, b2, wd, bd),
    with w*: (Cout, Cin_layer, K), biases (Cout,), wd: (Cout, Cin_layer) or
    None when Cin_layer == Cout (identity residual)."""
    B, Cin0, L = x_ncl.shape
    K = kernel_size
    nl = len(layer_params)
    chans = [Cin0] + [lp[0].shape[0] for lp in layer_params]
    Cp = _round_up(max(chans), 128)                # lane-dense channel padding
    dilations = tuple(2 ** i for i in range(nl))   # TemporalConvNet schedule
    maxpad = (K - 1) * dilations[-1]

    # ---- stack + pad weights (bf16 for the MXU, f32 biases) -----------------
    w1_l, b1_l, w2_l, b2_l, wd_l, bd_l, ds_index = [], [], [], [], [], [], []
    for (w1, b1, w2, b2, wd, bd) in layer_params:
        w1_l.append(_fold_taps(w1, Cp))
        w2_l.append(_fold_taps(w2, Cp))
        b1_l.append(_pad_bias(b1, Cp))
        b2_l.append(_pad_bias(b2, Cp))
        if wd is not None:
            ds_index.append(len(wd_l))
            wd_l.append(_pad_1x1(wd, Cp))
            bd_l.append(_pad_bias(bd, Cp))
        else:
            ds_index.append(None)
    if not wd_l:                                   # keep kernel signature fixed
        wd_l.append(jnp.zeros((Cp, Cp), jnp.float32))
        bd_l.append(jnp.zeros((1, Cp), jnp.float32))

    w1_s = jnp.stack(w1_l).astype(jnp.bfloat16)    # (nl, K*Cp, Cp)
    w2_s = jnp.stack(w2_l).astype(jnp.bfloat16)
    b1_s = jnp.stack(b1_l).astype(jnp.float32)     # (nl, 1, Cp)
    b2_s = jnp.stack(b2_l).astype(jnp.float32)
    wd_s = jnp.stack(wd_l).astype(jnp.bfloat16)    # (nds, Cp, Cp)
    bd_s = jnp.stack(bd_l).astype(jnp.float32)
    nds = wd_s.shape[0]

    # ---- activations: NCL -> NLC, channel-pad to Cp lanes, bf16 -------------
    x_nlc = jnp.transpose(x_ncl, (0, 2, 1))
    x_nlc = jnp.pad(x_nlc, ((0, 0), (0, 0), (0, Cp - Cin0))).astype(jnp.bfloat16)

    bt = _pick_batch_tile(B, L)                    # fold batch into M
    kernel = partial(_tcn_kernel, L=L, K=K, Cp=Cp, bt=bt,
                     dilations=dilations, maxpad=maxpad,
                     ds_index=tuple(ds_index))

    out_nlc = pl.pallas_call(
        kernel,
        out_shape=jax.ShapeDtypeStruct((B, L, Cp), jnp.float32),
        grid_spec=pltpu.PrefetchScalarGridSpec(
            num_scalar_prefetch=0,
            grid=(B // bt,),
            in_specs=[
                pl.BlockSpec((bt, L, Cp), lambda b: (b, 0, 0)),        # x
                pl.BlockSpec((nl, K * Cp, Cp), lambda b: (0, 0, 0)),   # w1
                pl.BlockSpec((nl, 1, Cp), lambda b: (0, 0, 0)),        # b1
                pl.BlockSpec((nl, K * Cp, Cp), lambda b: (0, 0, 0)),   # w2
                pl.BlockSpec((nl, 1, Cp), lambda b: (0, 0, 0)),        # b2
                pl.BlockSpec((nds, Cp, Cp), lambda b: (0, 0, 0)),      # wd
                pl.BlockSpec((nds, 1, Cp), lambda b: (0, 0, 0)),       # bd
            ],
            out_specs=pl.BlockSpec((bt, L, Cp), lambda b: (b, 0, 0)),
            scratch_shapes=[
                pltpu.VMEM((bt, maxpad + L, Cp), jnp.float32),  # block input
                pltpu.VMEM((bt, maxpad + L, Cp), jnp.float32),  # hidden h1
            ],
        ),
        compiler_params=pltpu.CompilerParams(
            dimension_semantics=("parallel",)),
    )(x_nlc, w1_s, b1_s, w2_s, b2_s, wd_s, bd_s)

    cout_last = chans[-1]
    return jnp.transpose(out_nlc[:, :, :cout_last], (0, 2, 1))   # (B, Cout, L)


# ----------------------------------------------------------------------------
# Parameter construction (weight_norm parameterization) + pure-JAX reference
# ----------------------------------------------------------------------------
def make_tcn_params(key, num_inputs, num_channels, kernel_size):
    params = []
    cin = num_inputs
    for cout in num_channels:
        key, k0, k1, k2, k3, k4, k5, k6, k7 = jax.random.split(key, 9)

        def wnorm(v, g):  # weight_norm: w = g * v / ||v||, norm over (in, k)
            nrm = jnp.sqrt(jnp.sum(v * v, axis=(1, 2), keepdims=True))
            return g[:, None, None] * v / nrm

        v1 = 0.01 * jax.random.normal(k0, (cout, cin, kernel_size), jnp.float32)
        g1 = 0.5 + jax.random.uniform(k1, (cout,), jnp.float32)
        w1 = wnorm(v1, g1)
        b1 = 0.1 * jax.random.normal(k2, (cout,), jnp.float32)
        v2 = 0.01 * jax.random.normal(k3, (cout, cout, kernel_size), jnp.float32)
        g2 = 0.5 + jax.random.uniform(k4, (cout,), jnp.float32)
        w2 = wnorm(v2, g2)
        b2 = 0.1 * jax.random.normal(k5, (cout,), jnp.float32)
        if cin != cout:
            wd = 0.01 * jax.random.normal(k6, (cout, cin), jnp.float32)
            bd = 0.1 * jax.random.normal(k7, (cout,), jnp.float32)
        else:
            wd, bd = None, None            # identity residual, no downsample
        params.append((w1, b1, w2, b2, wd, bd))
        cin = cout
    return params


def _reference_block(x_ncl, w1, b1, w2, b2, wd, bd, *, dilation, padding):
    L = x_ncl.shape[2]
    K = w1.shape[2]

    def causal_conv(x, w, b):
        xp = jnp.pad(x, ((0, 0), (0, 0), (padding, 0)))
        out = b[None, :, None]
        for k in range(K):
            out = out + jnp.einsum('oc,bct->bot', w[:, :, k],
                                   xp[:, :, k * dilation:k * dilation + L])
        return out

    h1 = jnp.maximum(causal_conv(x_ncl, w1, b1), 0.0)
    h2 = jnp.maximum(causal_conv(h1, w2, b2), 0.0)
    if wd is None:
        res = x_ncl
    else:
        res = jnp.einsum('oc,bct->bot', wd, x_ncl) + bd[None, :, None]
    return jnp.maximum(h2 + res, 0.0)


def reference_tcn_forward(x_ncl, layer_params, *, kernel_size):
    h = x_ncl
    for i, (w1, b1, w2, b2, wd, bd) in enumerate(layer_params):
        dil = 2 ** i
        pad = (kernel_size - 1) * dil
        h = _reference_block(h, w1, b1, w2, b2, wd, bd,
                             dilation=dil, padding=pad)
    return h


def _bf16_round(a):
    return a.astype(jnp.bfloat16).astype(jnp.float32)


if __name__ == "__main__":
    # TemporalConvNet(num_inputs=4, num_channels=[8, 8], kernel_size=2)
    # small shapes: batch=2, in-channels=4, seq_len=16
    B, L = 2, 16
    num_inputs, num_channels, kernel_size = 4, (8, 8), 2

    key = jax.random.PRNGKey(0)
    kx, kp = jax.random.split(key)
    x = jax.random.normal(kx, (B, num_inputs, L), jnp.float32)
    params = make_tcn_params(kp, num_inputs, num_channels, kernel_size)

    # Round x / matmul weights to bf16 precision once so the f32 reference and
    # the bf16-MXU kernel see identical operands; the remaining delta is only
    # intermediate-activation rounding (f32 accumulation on both sides).
    xq = _bf16_round(x)
    paramsq = [(_bf16_round(w1), b1, _bf16_round(w2), b2,
                None if wd is None else _bf16_round(wd), bd)
               for (w1, b1, w2, b2, wd, bd) in params]

    out = temporal_conv_net_forward(xq, paramsq, kernel_size=kernel_size)
    out = jax.block_until_ready(out)

    ref = reference_tcn_forward(xq, paramsq, kernel_size=kernel_size)

    assert out.shape == (B, num_channels[-1], L)
    assert jnp.allclose(out, ref, rtol=2e-2, atol=2e-2), "mismatch vs reference"
    print("KERNEL_OK")
</pallas_src>

<mosaic_0001>
module attributes {stable_mosaic.version = 11 : i64} {
  func.func @_tcn_kernel(%arg0: i32, %arg1: memref<2x16x128xbf16, #tpu.memory_space<vmem>>, %arg2: memref<2x256x128xbf16, #tpu.memory_space<vmem>>, %arg3: memref<2x1x128xf32, #tpu.memory_space<vmem>>, %arg4: memref<2x256x128xbf16, #tpu.memory_space<vmem>>, %arg5: memref<2x1x128xf32, #tpu.memory_space<vmem>>, %arg6: memref<1x128x128xbf16, #tpu.memory_space<vmem>>, %arg7: memref<1x1x128xf32, #tpu.memory_space<vmem>>, %arg8: memref<2x16x128xf32, #tpu.memory_space<vmem>>, %arg9: memref<2x18x128xf32, #tpu.memory_space<vmem>>, %arg10: memref<2x18x128xf32, #tpu.memory_space<vmem>>) attributes {dimension_semantics = [#tpu.dimension_semantics<parallel>], iteration_bounds = array<i64: 1>, scalar_prefetch = 0 : i64, scratch_operands = 2 : i64, tpu.core_type = #tpu.core_type<tc>, window_params = [{transform_indices = @transform_0, window_bounds = array<i64: 2, 16, 128>}, {pipeline_mode = #tpu.pipeline_mode<synchronous>, transform_indices = @transform_1, window_bounds = array<i64: 2, 256, 128>}, {pipeline_mode = #tpu.pipeline_mode<synchronous>, transform_indices = @transform_2, window_bounds = array<i64: 2, 1, 128>}, {pipeline_mode = #tpu.pipeline_mode<synchronous>, transform_indices = @transform_3, window_bounds = array<i64: 2, 256, 128>}, {pipeline_mode = #tpu.pipeline_mode<synchronous>, transform_indices = @transform_4, window_bounds = array<i64: 2, 1, 128>}, {pipeline_mode = #tpu.pipeline_mode<synchronous>, transform_indices = @transform_5, window_bounds = array<i64: 1, 128, 128>}, {pipeline_mode = #tpu.pipeline_mode<synchronous>, transform_indices = @transform_6, window_bounds = array<i64: 1, 1, 128>}, {transform_indices = @transform_7, window_bounds = array<i64: 2, 16, 128>}]} {
    %c0_i32 = arith.constant 0 : i32
    %0 = arith.cmpi eq, %arg0, %c0_i32 : i32
    %1 = arith.extui %0 : i1 to i32
    %c0_i32_0 = arith.constant 0 : i32
    %2 = arith.cmpi ne, %1, %c0_i32_0 : i32
    scf.if %2 {
      %cst_86 = arith.constant 0.000000e+00 : f32
      %92 = vector.broadcast %cst_86 : f32 to vector<2x2x128xf32>
      %c0_87 = arith.constant 0 : index
      %c0_88 = arith.constant 0 : index
      %c0_89 = arith.constant 0 : index
      %93 = vector.load %arg9[%c0_87, %c0_88, %c0_89] : memref<2x18x128xf32, #tpu.memory_space<vmem>>, vector<2x2x128xf32>
      tpu.vector_store %arg9[%c0_87, %c0_88, %c0_89], %92 {strides = array<i32>} : memref<2x18x128xf32, #tpu.memory_space<vmem>>, vector<2x2x128xf32>,
      %c0_90 = arith.constant 0 : index
      %c0_91 = arith.constant 0 : index
      %c0_92 = arith.constant 0 : index
      %94 = vector.load %arg10[%c0_90, %c0_91, %c0_92] : memref<2x18x128xf32, #tpu.memory_space<vmem>>, vector<2x2x128xf32>
      tpu.vector_store %arg10[%c0_90, %c0_91, %c0_92], %92 {strides = array<i32>} : memref<2x18x128xf32, #tpu.memory_space<vmem>>, vector<2x2x128xf32>,
    } else {
    }
    %c0 = arith.constant 0 : index
    %c0_1 = arith.constant 0 : index
    %c0_2 = arith.constant 0 : index
    %3 = vector.load %arg1[%c0, %c0_1, %c0_2] : memref<2x16x128xbf16, #tpu.memory_space<vmem>>, vector<2x16x128xbf16>
    %4 = arith.extf %3 : vector<2x16x128xbf16> to vector<2x16x128xf32>
    %c0_3 = arith.constant 0 : index
    %c2 = arith.constant 2 : index
    %c0_4 = arith.constant 0 : index
    %5 = vector.load %arg9[%c0_3, %c2, %c0_4] : memref<2x18x128xf32, #tpu.memory_space<vmem>>, vector<2x16x128xf32>
    tpu.vector_store %arg9[%c0_3, %c2, %c0_4], %4 {strides = array<i32>} : memref<2x18x128xf32, #tpu.memory_space<vmem>>, vector<2x16x128xf32>,
    %c0_5 = arith.constant 0 : index
    %c1 = arith.constant 1 : index
    %c0_6 = arith.constant 0 : index
    %6 = vector.load %arg9[%c0_5, %c1, %c0_6] : memref<2x18x128xf32, #tpu.memory_space<vmem>>, vector<2x16x128xf32>
    %7 = vector.shape_cast %6 : vector<2x16x128xf32> to vector<32x128xf32>
    %c0_7 = arith.constant 0 : index
    %c2_8 = arith.constant 2 : index
    %c0_9 = arith.constant 0 : index
    %8 = vector.load %arg9[%c0_7, %c2_8, %c0_9] : memref<2x18x128xf32, #tpu.memory_space<vmem>>, vector<2x16x128xf32>
    %9 = vector.shape_cast %8 : vector<2x16x128xf32> to vector<32x128xf32>
    %10 = tpu.concatenate %7, %9 in 1 : vector<32x128xf32>, vector<32x128xf32> -> vector<32x256xf32>
    %11 = arith.truncf %10 : vector<32x256xf32> to vector<32x256xbf16>
    %c0_10 = arith.constant 0 : index
    %c0_11 = arith.constant 0 : index
    %c0_12 = arith.constant 0 : index
    %12 = vector.load %arg2[%c0_10, %c0_11, %c0_12] : memref<2x256x128xbf16, #tpu.memory_space<vmem>>, vector<1x256x128xbf16>
    %13 = vector.shape_cast %12 : vector<1x256x128xbf16> to vector<256x128xbf16>
    %cst = arith.constant dense<0.000000e+00> : vector<32x128xf32>
    %14 = tpu.matmul %11, %13, %cst {dimension_numbers = #tpu.dot_dimension_numbers<[1], [0], [0], [1], [0, 0, 1, 1], [], []>} : vector<32x256xbf16>, vector<256x128xbf16>, vector<32x128xf32> -> vector<32x128xf32>
    %c0_13 = arith.constant 0 : index
    %c0_14 = arith.constant 0 : index
    %c0_15 = arith.constant 0 : index
    %15 = vector.load %arg3[%c0_13, %c0_14, %c0_15] : memref<2x1x128xf32, #tpu.memory_space<vmem>>, vector<1x1x128xf32>
    %16 = vector.shape_cast %15 : vector<1x1x128xf32> to vector<1x128xf32>
    %17 = vector.broadcast %16 : vector<1x128xf32> to vector<32x128xf32>
    %18 = arith.addf %14, %17 : vector<32x128xf32>
    %cst_16 = arith.constant 0.000000e+00 : f32
    %19 = vector.broadcast %cst_16 : f32 to vector<32x128xf32>
    %20 = arith.maximumf %18, %19 : vector<32x128xf32>
    %21 = vector.shape_cast %20 : vector<32x128xf32> to vector<2x16x128xf32>
    %c0_17 = arith.constant 0 : index
    %c2_18 = arith.constant 2 : index
    %c0_19 = arith.constant 0 : index
    %22 = vector.load %arg10[%c0_17, %c2_18, %c0_19] : memref<2x18x128xf32, #tpu.memory_space<vmem>>, vector<2x16x128xf32>
    tpu.vector_store %arg10[%c0_17, %c2_18, %c0_19], %21 {strides = array<i32>} : memref<2x18x128xf32, #tpu.memory_space<vmem>>, vector<2x16x128xf32>,
    %c0_20 = arith.constant 0 : index
    %c1_21 = arith.constant 1 : index
    %c0_22 = arith.constant 0 : index
    %23 = vector.load %arg10[%c0_20, %c1_21, %c0_22] : memref<2x18x128xf32, #tpu.memory_space<vmem>>, vector<2x16x128xf32>
    %24 = vector.shape_cast %23 : vector<2x16x128xf32> to vector<32x128xf32>
    %c0_23 = arith.constant 0 : index
    %c2_24 = arith.constant 2 : index
    %c0_25 = arith.constant 0 : index
    %25 = vector.load %arg10[%c0_23, %c2_24, %c0_25] : memref<2x18x128xf32, #tpu.memory_space<vmem>>, vector<2x16x128xf32>
    %26 = vector.shape_cast %25 : vector<2x16x128xf32> to vector<32x128xf32>
    %27 = tpu.concatenate %24, %26 in 1 : vector<32x128xf32>, vector<32x128xf32> -> vector<32x256xf32>
    %28 = arith.truncf %27 : vector<32x256xf32> to vector<32x256xbf16>
    %c0_26 = arith.constant 0 : index
    %c0_27 = arith.constant 0 : index
    %c0_28 = arith.constant 0 : index
    %29 = vector.load %arg4[%c0_26, %c0_27, %c0_28] : memref<2x256x128xbf16, #tpu.memory_space<vmem>>, vector<1x256x128xbf16>
    %30 = vector.shape_cast %29 : vector<1x256x128xbf16> to vector<256x128xbf16>
    %cst_29 = arith.constant dense<0.000000e+00> : vector<32x128xf32>
    %31 = tpu.matmul %28, %30, %cst_29 {dimension_numbers = #tpu.dot_dimension_numbers<[1], [0], [0], [1], [0, 0, 1, 1], [], []>} : vector<32x256xbf16>, vector<256x128xbf16>, vector<32x128xf32> -> vector<32x128xf32>
    %c0_30 = arith.constant 0 : index
    %c0_31 = arith.constant 0 : index
    %c0_32 = arith.constant 0 : index
    %32 = vector.load %arg5[%c0_30, %c0_31, %c0_32] : memref<2x1x128xf32, #tpu.memory_space<vmem>>, vector<1x1x128xf32>
    %33 = vector.shape_cast %32 : vector<1x1x128xf32> to vector<1x128xf32>
    %34 = vector.broadcast %33 : vector<1x128xf32> to vector<32x128xf32>
    %35 = arith.addf %31, %34 : vector<32x128xf32>
    %cst_33 = arith.constant 0.000000e+00 : f32
    %36 = vector.broadcast %cst_33 : f32 to vector<32x128xf32>
    %37 = arith.maximumf %35, %36 : vector<32x128xf32>
    %c0_34 = arith.constant 0 : index
    %c2_35 = arith.constant 2 : index
    %c0_36 = arith.constant 0 : index
    %38 = vector.load %arg9[%c0_34, %c2_35, %c0_36] : memref<2x18x128xf32, #tpu.memory_space<vmem>>, vector<2x16x128xf32>
    %39 = vector.shape_cast %38 : vector<2x16x128xf32> to vector<32x128xf32>
    %40 = arith.truncf %39 : vector<32x128xf32> to vector<32x128xbf16>
    %c0_37 = arith.constant 0 : index
    %c0_38 = arith.constant 0 : index
    %c0_39 = arith.constant 0 : index
    %41 = vector.load %arg6[%c0_37, %c0_38, %c0_39] : memref<1x128x128xbf16, #tpu.memory_space<vmem>>, vector<1x128x128xbf16>
    %42 = vector.shape_cast %41 : vector<1x128x128xbf16> to vector<128x128xbf16>
    %cst_40 = arith.constant dense<0.000000e+00> : vector<32x128xf32>
    %43 = tpu.matmul %40, %42, %cst_40 {dimension_numbers = #tpu.dot_dimension_numbers<[1], [0], [0], [1], [0, 0, 1, 1], [], []>} : vector<32x128xbf16>, vector<128x128xbf16>, vector<32x128xf32> -> vector<32x128xf32>
    %c0_41 = arith.constant 0 : index
    %c0_42 = arith.constant 0 : index
    %c0_43 = arith.constant 0 : index
    %44 = vector.load %arg7[%c0_41, %c0_42, %c0_43] : memref<1x1x128xf32, #tpu.memory_space<vmem>>, vector<1x1x128xf32>
    %45 = vector.shape_cast %44 : vector<1x1x128xf32> to vector<1x128xf32>
    %46 = vector.broadcast %45 : vector<1x128xf32> to vector<32x128xf32>
    %47 = arith.addf %43, %46 : vector<32x128xf32>
    %48 = arith.addf %37, %47 : vector<32x128xf32>
    %cst_44 = arith.constant 0.000000e+00 : f32
    %49 = vector.broadcast %cst_44 : f32 to vector<32x128xf32>
    %50 = arith.maximumf %48, %49 : vector<32x128xf32>
    %51 = vector.shape_cast %50 : vector<32x128xf32> to vector<2x16x128xf32>
    %c0_45 = arith.constant 0 : index
    %c2_46 = arith.constant 2 : index
    %c0_47 = arith.constant 0 : index
    %52 = vector.load %arg9[%c0_45, %c2_46, %c0_47] : memref<2x18x128xf32, #tpu.memory_space<vmem>>, vector<2x16x128xf32>
    tpu.vector_store %arg9[%c0_45, %c2_46, %c0_47], %51 {strides = array<i32>} : memref<2x18x128xf32, #tpu.memory_space<vmem>>, vector<2x16x128xf32>,
    %c0_48 = arith.constant 0 : index
    %c0_49 = arith.constant 0 : index
    %c0_50 = arith.constant 0 : index
    %53 = vector.load %arg9[%c0_48, %c0_49, %c0_50] : memref<2x18x128xf32, #tpu.memory_space<vmem>>, vector<2x16x128xf32>
    %54 = vector.shape_cast %53 : vector<2x16x128xf32> to vector<32x128xf32>
    %c0_51 = arith.constant 0 : index
    %c2_52 = arith.constant 2 : index
    %c0_53 = arith.constant 0 : index
    %55 = vector.load %arg9[%c0_51, %c2_52, %c0_53] : memref<2x18x128xf32, #tpu.memory_space<vmem>>, vector<2x16x128xf32>
    %56 = vector.shape_cast %55 : vector<2x16x128xf32> to vector<32x128xf32>
    %57 = tpu.concatenate %54, %56 in 1 : vector<32x128xf32>, vector<32x128xf32> -> vector<32x256xf32>
    %58 = arith.truncf %57 : vector<32x256xf32> to vector<32x256xbf16>
    %c1_54 = arith.constant 1 : index
    %c0_55 = arith.constant 0 : index
    %c0_56 = arith.constant 0 : index
    %59 = vector.load %arg2[%c1_54, %c0_55, %c0_56] : memref<2x256x128xbf16, #tpu.memory_space<vmem>>, vector<1x256x128xbf16>
    %60 = vector.shape_cast %59 : vector<1x256x128xbf16> to vector<256x128xbf16>
    %cst_57 = arith.constant dense<0.000000e+00> : vector<32x128xf32>
    %61 = tpu.matmul %58, %60, %cst_57 {dimension_numbers = #tpu.dot_dimension_numbers<[1], [0], [0], [1], [0, 0, 1, 1], [], []>} : vector<32x256xbf16>, vector<256x128xbf16>, vector<32x128xf32> -> vector<32x128xf32>
    %c1_58 = arith.constant 1 : index
    %c0_59 = arith.constant 0 : index
    %c0_60 = arith.constant 0 : index
    %62 = vector.load %arg3[%c1_58, %c0_59, %c0_60] : memref<2x1x128xf32, #tpu.memory_space<vmem>>, vector<1x1x128xf32>
    %63 = vector.shape_cast %62 : vector<1x1x128xf32> to vector<1x128xf32>
    %64 = vector.broadcast %63 : vector<1x128xf32> to vector<32x128xf32>
    %65 = arith.addf %61, %64 : vector<32x128xf32>
    %cst_61 = arith.constant 0.000000e+00 : f32
    %66 = vector.broadcast %cst_61 : f32 to vector<32x128xf32>
    %67 = arith.maximumf %65, %66 : vector<32x128xf32>
    %68 = vector.shape_cast %67 : vector<32x128xf32> to vector<2x16x128xf32>
    %c0_62 = arith.constant 0 : index
    %c2_63 = arith.constant 2 : index
    %c0_64 = arith.constant 0 : index
    %69 = vector.load %arg10[%c0_62, %c2_63, %c0_64] : memref<2x18x128xf32, #tpu.memory_space<vmem>>, vector<2x16x128xf32>
    tpu.vector_store %arg10[%c0_62, %c2_63, %c0_64], %68 {strides = array<i32>} : memref<2x18x128xf32, #tpu.memory_space<vmem>>, vector<2x16x128xf32>,
    %c0_65 = arith.constant 0 : index
    %c0_66 = arith.constant 0 : index
    %c0_67 = arith.constant 0 : index
    %70 = vector.load %arg10[%c0_65, %c0_66, %c0_67] : memref<2x18x128xf32, #tpu.memory_space<vmem>>, vector<2x16x128xf32>
    %71 = vector.shape_cast %70 : vector<2x16x128xf32> to vector<32x128xf32>
    %c0_68 = arith.constant 0 : index
    %c2_69 = arith.constant 2 : index
    %c0_70 = arith.constant 0 : index
    %72 = vector.load %arg10[%c0_68, %c2_69, %c0_70] : memref<2x18x128xf32, #tpu.memory_space<vmem>>, vector<2x16x128xf32>
    %73 = vector.shape_cast %72 : vector<2x16x128xf32> to vector<32x128xf32>
    %74 = tpu.concatenate %71, %73 in 1 : vector<32x128xf32>, vector<32x128xf32> -> vector<32x256xf32>
    %75 = arith.truncf %74 : vector<32x256xf32> to vector<32x256xbf16>
    %c1_71 = arith.constant 1 : index
    %c0_72 = arith.constant 0 : index
    %c0_73 = arith.constant 0 : index
    %76 = vector.load %arg4[%c1_71, %c0_72, %c0_73] : memref<2x256x128xbf16, #tpu.memory_space<vmem>>, vector<1x256x128xbf16>
    %77 = vector.shape_cast %76 : vector<1x256x128xbf16> to vector<256x128xbf16>
    %cst_74 = arith.constant dense<0.000000e+00> : vector<32x128xf32>
    %78 = tpu.matmul %75, %77, %cst_74 {dimension_numbers = #tpu.dot_dimension_numbers<[1], [0], [0], [1], [0, 0, 1, 1], [], []>} : vector<32x256xbf16>, vector<256x128xbf16>, vector<32x128xf32> -> vector<32x128xf32>
    %c1_75 = arith.constant 1 : index
    %c0_76 = arith.constant 0 : index
    %c0_77 = arith.constant 0 : index
    %79 = vector.load %arg5[%c1_75, %c0_76, %c0_77] : memref<2x1x128xf32, #tpu.memory_space<vmem>>, vector<1x1x128xf32>
    %80 = vector.shape_cast %79 : vector<1x1x128xf32> to vector<1x128xf32>
    %81 = vector.broadcast %80 : vector<1x128xf32> to vector<32x128xf32>
    %82 = arith.addf %78, %81 : vector<32x128xf32>
    %cst_78 = arith.constant 0.000000e+00 : f32
    %83 = vector.broadcast %cst_78 : f32 to vector<32x128xf32>
    %84 = arith.maximumf %82, %83 : vector<32x128xf32>
    %c0_79 = arith.constant 0 : index
    %c2_80 = arith.constant 2 : index
    %c0_81 = arith.constant 0 : index
    %85 = vector.load %arg9[%c0_79, %c2_80, %c0_81] : memref<2x18x128xf32, #tpu.memory_space<vmem>>, vector<2x16x128xf32>
    %86 = vector.shape_cast %85 : vector<2x16x128xf32> to vector<32x128xf32>
    %87 = arith.addf %84, %86 : vector<32x128xf32>
    %cst_82 = arith.constant 0.000000e+00 : f32
    %88 = vector.broadcast %cst_82 : f32 to vector<32x128xf32>
    %89 = arith.maximumf %87, %88 : vector<32x128xf32>
    %90 = vector.shape_cast %89 : vector<32x128xf32> to vector<2x16x128xf32>
    %c0_83 = arith.constant 0 : index
    %c0_84 = arith.constant 0 : index
    %c0_85 = arith.constant 0 : index
    %91 = vector.load %arg8[%c0_83, %c0_84, %c0_85] : memref<2x16x128xf32, #tpu.memory_space<vmem>>, vector<2x16x128xf32>
    tpu.vector_store %arg8[%c0_83, %c0_84, %c0_85], %90 {strides = array<i32>} : memref<2x16x128xf32, #tpu.memory_space<vmem>>, vector<2x16x128xf32>,
    return
  }
  func.func @transform_0(%arg0: i32) -> (i32, i32, i32) {
    %c0_i32 = arith.constant 0 : i32
    %c0_i32_0 = arith.constant 0 : i32
    %c0_i32_1 = arith.constant 0 : i32
    return %arg0, %c0_i32, %c0_i32_0 : i32, i32, i32
  }
  func.func @transform_1(%arg0: i32) -> (i32, i32, i32) {
    %c0_i32 = arith.constant 0 : i32
    %c0_i32_0 = arith.constant 0 : i32
    %c0_i32_1 = arith.constant 0 : i32
    %c0_i32_2 = arith.constant 0 : i32
    return %c0_i32, %c0_i32_0, %c0_i32_1 : i32, i32, i32
  }
  func.func @transform_2(%arg0: i32) -> (i32, i32, i32) {
    %c0_i32 = arith.constant 0 : i32
    %c0_i32_0 = arith.constant 0 : i32
    %c0_i32_1 = arith.constant 0 : i32
    %c0_i32_2 = arith.constant 0 : i32
    return %c0_i32, %c0_i32_0, %c0_i32_1 : i32, i32, i32
  }
  func.func @transform_3(%arg0: i32) -> (i32, i32, i32) {
    %c0_i32 = arith.constant 0 : i32
    %c0_i32_0 = arith.constant 0 : i32
    %c0_i32_1 = arith.constant 0 : i32
    %c0_i32_2 = arith.constant 0 : i32
    return %c0_i32, %c0_i32_0, %c0_i32_1 : i32, i32, i32
  }
  func.func @transform_4(%arg0: i32) -> (i32, i32, i32) {
    %c0_i32 = arith.constant 0 : i32
    %c0_i32_0 = arith.constant 0 : i32
    %c0_i32_1 = arith.constant 0 : i32
    %c0_i32_2 = arith.constant 0 : i32
    return %c0_i32, %c0_i32_0, %c0_i32_1 : i32, i32, i32
  }
  func.func @transform_5(%arg0: i32) -> (i32, i32, i32) {
    %c0_i32 = arith.constant 0 : i32
    %c0_i32_0 = arith.constant 0 : i32
    %c0_i32_1 = arith.constant 0 : i32
    %c0_i32_2 = arith.constant 0 : i32
    return %c0_i32, %c0_i32_0, %c0_i32_1 : i32, i32, i32
  }
  func.func @transform_6(%arg0: i32) -> (i32, i32, i32) {
    %c0_i32 = arith.constant 0 : i32
    %c0_i32_0 = arith.constant 0 : i32
    %c0_i32_1 = arith.constant 0 : i32
    %c0_i32_2 = arith.constant 0 : i32
    return %c0_i32, %c0_i32_0, %c0_i32_1 : i32, i32, i32
  }
  func.func @transform_7(%arg0: i32) -> (i32, i32, i32) {
    %c0_i32 = arith.constant 0 : i32
    %c0_i32_0 = arith.constant 0 : i32
    %c0_i32_1 = arith.constant 0 : i32
    return %arg0, %c0_i32, %c0_i32_0 : i32, i32, i32
  }
}

</mosaic_0001>

<bundles_post_ra>
// kernel: tpu_custom_call.1
= control target key start
LH: loop header
LB: loop body
LE: loop exit
PB: predicated region body
PF: predicated region fallthrough
CT: control target
= control target key end

     0   :  { %12 = vsyncpa [#allocation5], 0  ;;  %s1685_s0 = inlined_call_operand.hbm [shape: bf16[2,16,128], index: 0, kind: input, shape index: {}]   ;;  %s1686_s1 = inlined_call_operand.hbm [shape: bf16[2,256,128], index: 1, kind: input, shape index: {}]   ;;  %s1687_s2 = inlined_call_operand.hbm [shape: f32[2,1,128], index: 2, kind: input, shape index: {}]   ;;  %s1688_s3 = inlined_call_operand.hbm [shape: bf16[2,256,128], index: 3, kind: input, shape index: {}]   ;;  %s1689_s4 = inlined_call_operand.vmem [shape: f32[2,1,128], index: 4, kind: input, shape index: {}]   ;;  %s1690_s5 = inlined_call_operand.hbm [shape: bf16[1,128,128], index: 5, kind: input, shape index: {}]   ;;  %s1691_s6 = inlined_call_operand.vmem [shape: f32[1,1,128], index: 6, kind: input, shape index: {}]   ;;  %s1692_s7 = inlined_call_operand.hbm [shape: f32[2,16,128], index: 7, kind: output, shape index: {}]  }
   0x1   :  { %13 = vsyncpa [#allocation8], 0 }
   0x2   :  { %14 = vsyncpa [#allocation11], 0 }
   0x3   :  { %15 = vsyncpa [#allocation6], 0  ;;  %s33_s26 = sshll.u32 %s1686_s1, 4  ;;  %s1573_s27 = smov [#allocation7]   ;;  %s34_s26 = int_to_ptr.hbm [resolvable:$true] %s33_s26 }
   0x4   :  { %s35_s28 = sshll.u32 %s1573_s27, 4  ;;  %s59_s8 = sshll.u32 %s1688_s3, 4  ;;  %s36_s28 = int_to_ptr.vmem [resolvable:$true] %s35_s28  ;;  %s60_s8 = int_to_ptr.hbm [resolvable:$true] %s59_s8 }
   0x5   :  { %s1574_s9 = smov 64   ;;  %s1575_s10 = smov 4  }
   0x6   :  { %41 = dma.hbm_to_vmem [thread:$0]  %s34_s26, 4096, %s36_s28, [#allocation8], %s1574_s9, %s1574_s9, %s1575_s10  }
   0x7   :  { %s1576_s11 = smov [#allocation10]   ;;  %s20_s1 = sshll.u32 %s1685_s0, 4  ;;  %s21_s1 = int_to_ptr.hbm [resolvable:$true] %s20_s1 }
   0x8   :  { %s61_s12 = sshll.u32 %s1576_s11, 4  ;;  %s46_s16 = sshll.u32 %s1687_s2, 4  ;;  %s62_s12 = int_to_ptr.vmem [resolvable:$true] %s61_s12  ;;  %s47_s16 = int_to_ptr.hbm [resolvable:$true] %s46_s16 }
   0x9   :  { %67 = dma.hbm_to_vmem [thread:$0]  %s60_s8, 4096, %s62_s12, [#allocation11], %s1574_s9, %s1574_s9, %s1575_s10  }
   0xa   :  { %s1577_s17 = smov [#allocation4]   ;;  %s1578_s19 = smov [#allocation9]  }
   0xb   :  { %s22_s18 = sshll.u32 %s1577_s17, 4  ;;  %s48_s0 = sshll.u32 %s1578_s19, 4  ;;  %s23_s18 = int_to_ptr.vmem [resolvable:$true] %s22_s18  ;;  %s49_s0 = int_to_ptr.vmem [resolvable:$true] %s48_s0 }
   0xc   :  { %28 = dma.hbm_to_vmem [thread:$0]  %s21_s1, 256, %s23_s18, [#allocation5], %s1574_s9, %s1574_s9, %s1575_s10  }
   0xd   :  { %s1579_s20 = smov 16   ;;  %s1580_s21 = smov 1  }
   0xe   :  { %54 = dma.hbm_to_vmem [thread:$0]  %s47_s16, 32, %s49_s0, [#allocation8], %s1579_s20, %s1579_s20, %s1580_s21  }
   0xf   :  { %s74_s24 = sshll.u32 %s1690_s5, 4  ;;  %s1581_s2 = smov [#allocation12]   ;;  %s75_s24 = int_to_ptr.hbm [resolvable:$true] %s74_s24 }
  0x10   :  { %s76_s25 = sshll.u32 %s1581_s2, 4  ;;  %s77_s25 = int_to_ptr.vmem [resolvable:$true] %s76_s25 }
  0x11   :  { %82 = dma.hbm_to_vmem [thread:$0]  %s75_s24, 1024, %s77_s25, [#allocation11], %s1574_s9, %s1574_s9, %s1575_s10  }
  0x12   :  { %1565 = dma.done.wait [#allocation5], 256  }
  0x13   :  { %1566 = vsyncadd [#allocation5], 4294967040 }
  0x14   :  { %1567 = dma.done.wait [#allocation8], 4128  }
  0x15   :  { %1568 = vsyncadd [#allocation8], 4294963168 }
  0x16   :  { %1569 = dma.done.wait [#allocation11], 5120  }
  0x17   :  { %1570 = vsyncadd [#allocation11], 4294962176  ;;  %v1582_v0 = vmov 0.0   ;;  %v1319_v1 = vld [vmem:[#allocation7 + $0x38] sm:$0xff]  ;;  %v1318_v3 = vld [vmem:[#allocation7 + $0x30] sm:$0xff]  ;;  %s1008_s10 = sshll.u32 %s1692_s7, 4  ;;  %s1009_s10 = int_to_ptr.hbm [resolvable:$true] %s1008_s10 }
  0x18   :  { %109 = vst [vmem:[#allocation2] sm:$0x3] %v1582_v0  ;;  %v1327_v2 = vld [vmem:[#allocation7 + $0x78] sm:$0xff]  ;;  %269 = vmatpush.bf16.msra.mxu0 %v1319_v1  ;;  %v1326_v4 = vld [vmem:[#allocation7 + $0x70] sm:$0xff]  ;;  %v1317_v5 = vld [vmem:[#allocation7 + $0x28] sm:$0xff]  ;;  %s1584_s11 = smov 128  }
  0x19   :  { %110 = vst [vmem:[#allocation2 + $0x18] sm:$0x3] %v1582_v0  ;;  %288 = vmatpush.bf16.msra.mxu1 %v1327_v2  ;;  %v1325_v6 = vld [vmem:[#allocation7 + $0x68] sm:$0xff]  ;;  %v1385_v7 = vld [vmem:[#allocation4] sm:$0xff]   ;;  %v1392_v10 = vld [vmem:[#allocation4 + $0x8] sm:$0xff]   ;;  %s1585_s12 = smov 8  }
  0x1a   :  { %111 = vst [vmem:[#allocation3] sm:$0x3] %v1582_v0  ;;  %v1386_v8 = vunpack.c.l.bf16 %v1385_v7  ;;  %v1387_v9 = vunpack.c.h.bf16 %v1385_v7  ;;  %v1390_v11 = vunpack.c.l.bf16 %v1392_v10  ;;  %v1391_v12 = vunpack.c.h.bf16 %v1392_v10  ;;  %v1316_v13 = vld [vmem:[#allocation7 + $0x20] sm:$0xff]  ;;  %v1315_v15 = vld [vmem:[#allocation7 + $0x18] sm:$0xff]  ;;  %v1314_v19 = vld [vmem:[#allocation7 + $0x10] sm:$0xff] }
  0x1b   :  { %112 = vst [vmem:[#allocation3 + $0x18] sm:$0x3] %v1582_v0  ;;  %v1324_v14 = vld [vmem:[#allocation7 + $0x60] sm:$0xff]  ;;  %v1323_v16 = vld [vmem:[#allocation7 + $0x58] sm:$0xff]  ;;  %v1322_v20 = vld [vmem:[#allocation7 + $0x50] sm:$0xff] }
  0x1c   :  { %270 = vmatpush.bf16.msra.mxu0 %v1318_v3  ;;  %121 = vst [vmem:[#allocation2 + $0x2] sm:$0xff] %v1386_v8  ;;  %v1335_v17 = vld [vmem:[#allocation10 + $0x38] sm:$0xff]  ;;  %v1334_v21 = vld [vmem:[#allocation10 + $0x30] sm:$0xff]  ;;  %v1313_v23 = vld [vmem:[#allocation7 + $0x8] sm:$0xff] }
  0x1d   :  { %289 = vmatpush.bf16.msra.mxu1 %v1326_v4  ;;  %122 = vst [vmem:[#allocation2 + $0xa] sm:$0xff] %v1387_v9  ;;  %v1343_v18 = vld [vmem:[#allocation10 + $0x78] sm:$0xff]  ;;  %459 = vmatpush.bf16.msra.mxu2 %v1335_v17  ;;  %v1342_v22 = vld [vmem:[#allocation10 + $0x70] sm:$0xff]  ;;  %v1321_v24 = vld [vmem:[#allocation7 + $0x48] sm:$0xff] }
  0x1e   :  { %123 = vst [vmem:[#allocation2 + $0x1a] sm:$0xff] %v1390_v11  ;;  %478 = vmatpush.bf16.msra.mxu3 %v1343_v18  ;;  %v1312_v25 = vld [vmem:[#allocation7] sm:$0xff]  ;;  %v1414_v31 = vld [vmem:[#allocation4] sm:$0xff]  ;;  %v1415_v35 = vld [vmem:[#allocation4 + $0x8] sm:$0xff] }
  0x1f   :  { %124 = vst [vmem:[#allocation2 + $0x22] sm:$0xff] %v1391_v12  ;;  %v1320_v26 = vld [vmem:[#allocation7 + $0x40] sm:$0xff]  ;;  %v1341_v36 = vld [vmem:[#allocation10 + $0x68] sm:$0xff]  ;;  %v1350_v38 = vld [vmem:[#allocation12 + $0x30] sm:$0xff] }
  0x20   :  { %271 = vmatpush.bf16.msra.mxu0 %v1317_v5  ;;  %v1351_v29 = vld [vmem:[#allocation12 + $0x38] sm:$0xff]  ;;  %v1340_v37 = vld [vmem:[#allocation10 + $0x60] sm:$0xff]  ;;  %v1333_v39 = vld [vmem:[#allocation10 + $0x28] sm:$0xff] }
  0x21   :  { %290 = vmatpush.bf16.msra.mxu1 %v1325_v6  ;;  %460 = vmatpush.bf16.msra.mxu2 %v1334_v21  ;;  %v1339_v40 = vld [vmem:[#allocation10 + $0x58] sm:$0xff]  ;;  %v1349_v41 = vld [vmem:[#allocation12 + $0x28] sm:$0xff]  ;;  %v1332_v42 = vld [vmem:[#allocation10 + $0x20] sm:$0xff] }
  0x22   :  { %479 = vmatpush.bf16.msra.mxu3 %v1342_v22  ;;  %v1338_v43 = vld [vmem:[#allocation10 + $0x50] sm:$0xff]  ;;  %v1348_v44 = vld [vmem:[#allocation12 + $0x20] sm:$0xff]  ;;  %v1331_v45 = vld [vmem:[#allocation10 + $0x18] sm:$0xff] }
  0x23   :  { %v125_v27 = vld [vmem:[#allocation2 + $0x1] sm:$0xff]  ;;  %v1347_v47 = vld [vmem:[#allocation12 + $0x18] sm:$0xff]  ;;  %v1336_v49 = vld [vmem:[#allocation10 + $0x40] sm:$0xff] }
  0x24   :  { %272 = vmatpush.bf16.msra.mxu0 %v1316_v13  ;;  %v126_v28 = vld [vmem:[#allocation2 + $0x9] sm:$0xff]  ;;  %v1337_v46 = vld [vmem:[#allocation10 + $0x48] sm:$0xff]  ;;  %v1328_v53 = vld [vmem:[#allocation10] sm:$0xff] }
  0x25   :  { %291 = vmatpush.bf16.msra.mxu1 %v1324_v14  ;;  %v133_v30 = vpack.c.bf16 %v126_v28, %v125_v27  ;;  %v127_v32 = vld [vmem:[#allocation2 + $0x19] sm:$0xff]  ;;  %461 = vmatpush.bf16.msra.mxu2 %v1333_v39  ;;  %v1330_v48 = vld [vmem:[#allocation10 + $0x10] sm:$0xff]  ;;  %v1416_v55 = vld [vmem:[#allocation9] ss:$0 sm:$0xff] }
  0x26   :  { %v128_v33 = vld [vmem:[#allocation2 + $0x21] sm:$0xff]  ;;  %480 = vmatpush.bf16.msra.mxu3 %v1341_v36  ;;  %v1344_v54 = vld [vmem:[#allocation12] sm:$0xff]  ;;  %v1417_v39 = vld [vmem:[%s1691_s6] ss:$0 sm:$0xff] }
  0x27   :  { %v135_v34 = vpack.c.bf16 %v128_v33, %v127_v32  ;;  %v1346_v50 = vld [vmem:[#allocation12 + $0x10] sm:$0xff]  ;;  %v1329_v51 = vld [vmem:[#allocation10 + $0x8] sm:$0xff]  ;;  %v1356_v28 = vld [vmem:[#allocation7 + $0xa0] sm:$0xff] }
  0x28   :  { %273 = vmatpush.bf16.msra.mxu0 %v1315_v15  ;;  %v1345_v52 = vld [vmem:[#allocation12 + $0x8] sm:$0xff]  ;;  %v1359_v21 = vld [vmem:[#allocation7 + $0xb8] sm:$0xff]  ;;  %v1360_v33 = vld [vmem:[#allocation7 + $0xc0] sm:$0xff] }
  0x29   :  { %292 = vmatpush.bf16.msra.mxu1 %v1323_v16  ;;  %462 = vmatpush.bf16.msra.mxu2 %v1332_v42  ;;  %v1366_v22 = vld [vmem:[#allocation7 + $0xf0] sm:$0xff]  ;;  %v1363_v27 = vld [vmem:[#allocation7 + $0xd8] sm:$0xff] }
  0x2a   :  { %481 = vmatpush.bf16.msra.mxu3 %v1340_v37  ;;  %v1354_v32 = vld [vmem:[#allocation7 + $0x90] sm:$0xff] }
  0x2c   :  { %274 = vmatpush.bf16.msra.mxu0 %v1314_v19 }
  0x2d   :  { %293 = vmatpush.bf16.msra.mxu1 %v1322_v20  ;;  %463 = vmatpush.bf16.msra.mxu2 %v1331_v45  ;;  %v1367_v20 = vld [vmem:[#allocation7 + $0xf8] sm:$0xff] }
  0x2e   :  { %482 = vmatpush.bf16.msra.mxu3 %v1339_v40 }
  0x30   :  { %275 = vmatpush.bf16.msra.mxu0 %v1313_v23  ;;  %v1365_v23 = vld [vmem:[#allocation7 + $0xe8] sm:$0xff] }
  0x31   :  { %294 = vmatpush.bf16.msra.mxu1 %v1321_v24  ;;  %464 = vmatpush.bf16.msra.mxu2 %v1330_v48  ;;  %v1358_v24 = vld [vmem:[#allocation7 + $0xb0] sm:$0xff] }
  0x32   :  { %483 = vmatpush.bf16.msra.mxu3 %v1338_v43 }
  0x34   :  { %276 = vmatpush.bf16.msra.mxu0 %v1312_v25  ;;  %v1364_v25 = vld [vmem:[#allocation7 + $0xe0] sm:$0xff] }
  0x35   :  { %295 = vmatpush.bf16.msra.mxu1 %v1320_v26  ;;  %465 = vmatpush.bf16.msra.mxu2 %v1329_v51  ;;  %v1357_v26 = vld [vmem:[#allocation7 + $0xa8] sm:$0xff] }
  0x36   :  { %484 = vmatpush.bf16.msra.mxu3 %v1337_v46 }
  0x37   :  { %277 = vmatmul.bf16.vlgmr.msra.gmra.mxu0 %v133_v30  ;;  %v1355_v30 = vld [vmem:[#allocation7 + $0x98] sm:$0xff] }
  0x38   :  { %575 = vmatpush.bf16.msrb.mxu0 %v1351_v29  ;;  %296 = vmatmul.bf16.vlgmr.msra.gmra.mxu1 %v1414_v31  ;;  %v1362_v29 = vld [vmem:[#allocation7 + $0xd0] sm:$0xff] }
  0x39   :  { %466 = vmatpush.bf16.msra.mxu2 %v1328_v53  ;;  %752 = vmatpush.bf16.msrb.mxu1 %v1359_v21  ;;  %v1381_v21 = vld [vmem:[#allocation10 + $0xe8] sm:$0xff] }
  0x3a   :  { %485 = vmatpush.bf16.msra.mxu3 %v1336_v49 }
  0x3c   :  { %576 = vmatpush.bf16.msrb.mxu0 %v1350_v38  ;;  %v1418_v38 = vld [vmem:[%s1689_s4] ss:$0 sm:$0xff] }
  0x3d   :  { %771 = vmatpush.bf16.msrb.mxu2 %v1367_v20  ;;  %753 = vmatpush.bf16.msrb.mxu1 %v1358_v24  ;;  %v1382_v20 = vld [vmem:[#allocation10 + $0xf0] sm:$0xff]  ;;  %v1373_v24 = vld [vmem:[#allocation10 + $0xa8] sm:$0xff] }
  0x40   :  { %577 = vmatpush.bf16.msrb.mxu0 %v1349_v41 }
  0x41   :  { %772 = vmatpush.bf16.msrb.mxu2 %v1366_v22  ;;  %754 = vmatpush.bf16.msrb.mxu1 %v1357_v26  ;;  %v1374_v22 = vld [vmem:[#allocation10 + $0xb0] sm:$0xff]  ;;  %v1372_v26 = vld [vmem:[#allocation10 + $0xa0] sm:$0xff] }
  0x44   :  { %578 = vmatpush.bf16.msrb.mxu0 %v1348_v44 }
  0x45   :  { %773 = vmatpush.bf16.msrb.mxu2 %v1365_v23  ;;  %755 = vmatpush.bf16.msrb.mxu1 %v1356_v28  ;;  %v1380_v23 = vld [vmem:[#allocation10 + $0xe0] sm:$0xff]  ;;  %v1371_v28 = vld [vmem:[#allocation10 + $0x98] sm:$0xff] }
  0x47   :  { %282 = vmatmul.bf16.gmra.mxu0 %v135_v34  ;;  %v1353_v34 = vld [vmem:[#allocation7 + $0x88] sm:$0xff] }
  0x48   :  { %301 = vmatmul.bf16.gmra.mxu1 %v1415_v35  ;;  %579 = vmatpush.bf16.msrb.mxu0 %v1347_v47 }
  0x49   :  { %774 = vmatpush.bf16.msrb.mxu2 %v1364_v25  ;;  %756 = vmatpush.bf16.msrb.mxu1 %v1355_v30  ;;  %v1379_v25 = vld [vmem:[#allocation10 + $0xd8] sm:$0xff]  ;;  %v1370_v30 = vld [vmem:[#allocation10 + $0x90] sm:$0xff] }
  0x4c   :  { %580 = vmatpush.bf16.msrb.mxu0 %v1346_v50 }
  0x4d   :  { %775 = vmatpush.bf16.msrb.mxu2 %v1363_v27  ;;  %757 = vmatpush.bf16.msrb.mxu1 %v1354_v32  ;;  %v1378_v27 = vld [vmem:[#allocation10 + $0xd0] sm:$0xff]  ;;  %v1369_v32 = vld [vmem:[#allocation10 + $0x88] sm:$0xff] }
  0x50   :  { %581 = vmatpush.bf16.msrb.mxu0 %v1345_v52 }
  0x51   :  { %776 = vmatpush.bf16.msrb.mxu2 %v1362_v29  ;;  %758 = vmatpush.bf16.msrb.mxu1 %v1353_v34  ;;  %v1377_v29 = vld [vmem:[#allocation10 + $0xc8] sm:$0xff]  ;;  %v1419_v34 = vld [vmem:[#allocation9 + $0x1] ss:$0 sm:$0xff] }
  0x54   :  { %582 = vmatpush.bf16.msrb.mxu0 %v1344_v54  ;;  %v1375_v54 = vld [vmem:[#allocation10 + $0xb8] sm:$0xff] }
  0x55   :  { %944 = vmatpush.bf16.msrb.mxu3 %v1375_v54 }
  0x57   :  { %583 = vmatmul.bf16.vlgmr.msrb.gmra.mxu0 %v1414_v31  ;;  %v1361_v31 = vld [vmem:[#allocation7 + $0xc8] sm:$0xff] }
  0x58   :  { %777 = vmatpush.bf16.msrb.mxu2 %v1361_v31  ;;  %v1376_v31 = vld [vmem:[#allocation10 + $0xc0] sm:$0xff] }
  0x59   :  { %945 = vmatpush.bf16.msrb.mxu3 %v1374_v22 }
  0x5c   :  { %778 = vmatpush.bf16.msrb.mxu2 %v1360_v33  ;;  %v1368_v33 = vld [vmem:[#allocation10 + $0x80] sm:$0xff] }
  0x5d   :  { %946 = vmatpush.bf16.msrb.mxu3 %v1373_v24 }
  0x61   :  { %947 = vmatpush.bf16.msrb.mxu3 %v1372_v26 }
  0x65   :  { %948 = vmatpush.bf16.msrb.mxu3 %v1371_v28 }
  0x67   :  { %588 = vmatmul.bf16.gmra.mxu0 %v1415_v35  ;;  %v1352_v35 = vld [vmem:[#allocation7 + $0x80] sm:$0xff] }
  0x68   :  { %759 = vmatpush.bf16.msrb.mxu1 %v1352_v35 }
  0x69   :  { %949 = vmatpush.bf16.msrb.mxu3 %v1370_v30 }
  0x6d   :  { %950 = vmatpush.bf16.msrb.mxu3 %v1369_v32 }
  0x71   :  { %951 = vmatpush.bf16.msrb.mxu3 %v1368_v33 }
  0xb4   :  { %v278_v56 = vpop.f32.mrf.mxu0 }
  0xb5   :  { %v297_v57 = vpop.f32.mrf.mxu1  ;;  %v279_v58 = vadd.f32 %v1416_v55, %v278_v56 }
  0xb7   :  { %v298_v59 = vadd.f32 %v297_v57, %v279_v58 }
  0xb9   :  { %v307_v60 = vmax.f32 %v298_v59, 0.0 }
  0xbb   :  { %311 = vst [vmem:[#allocation3 + $0x2] sm:$0xff] %v307_v60 }
  0xbc   :  { %v280_v61 = vpop.f32.mrf.mxu0 }
  0xbd   :  { %v299_v62 = vpop.f32.mrf.mxu1  ;;  %v281_v63 = vadd.f32 %v1416_v55, %v280_v61 }
  0xbf   :  { %v300_v0 = vadd.f32 %v299_v62, %v281_v63 }
  0xc1   :  { %v308_v1 = vmax.f32 %v300_v0, 0.0 }
  0xc2   :  { %v315_v8 = vld [vmem:[#allocation3 + $0x1] sm:$0xff] }
  0xc3   :  { %312 = vst [vmem:[#allocation3 + $0xa] sm:$0xff] %v308_v1  ;;  %v324_v2 = vpack.c.bf16 %v308_v1, %v307_v60 }
  0xc4   :  { %v283_v3 = vpop.f32.mrf.mxu0 }
  0xc5   :  { %v302_v4 = vpop.f32.mrf.mxu1  ;;  %v284_v5 = vadd.f32 %v1416_v55, %v283_v3  ;;  %486 = vmatmul.bf16.vlgmr.msra.gmra.mxu3 %v324_v2 }
  0xc7   :  { %v303_v6 = vadd.f32 %v302_v4, %v284_v5 }
  0xc9   :  { %v309_v7 = vmax.f32 %v303_v6, 0.0 }
  0xca   :  { %v316_v9 = vld [vmem:[#allocation3 + $0x9] sm:$0xff] }
  0xcb   :  { %313 = vst [vmem:[#allocation3 + $0x1a] sm:$0xff] %v309_v7  ;;  %v323_v10 = vpack.c.bf16 %v316_v9, %v315_v8 }
  0xcc   :  { %v285_v11 = vpop.f32.mrf.mxu0 }
  0xcd   :  { %v286_v12 = vadd.f32 %v1416_v55, %v285_v11  ;;  %467 = vmatmul.bf16.vlgmr.msra.gmra.mxu2 %v323_v10  ;;  %v304_v13 = vpop.f32.mrf.mxu1  ;;  %v1383_v55 = vld [vmem:[#allocation10 + $0xf8] sm:$0xff] }
  0xce   :  { %963 = vmatpush.bf16.msra.mxu0 %v1383_v55  ;;  %1393 = vmatpush.bf16.msra.mxu1 %v1383_v55 }
  0xcf   :  { %v305_v14 = vadd.f32 %v304_v13, %v286_v12 }
  0xd1   :  { %v310_v15 = vmax.f32 %v305_v14, 0.0 }
  0xd2   :  { %v317_v17 = vld [vmem:[#allocation3 + $0x19] sm:$0xff]  ;;  %964 = vmatpush.bf16.msra.mxu0 %v1382_v20  ;;  %1394 = vmatpush.bf16.msra.mxu1 %v1382_v20 }
  0xd3   :  { %314 = vst [vmem:[#allocation3 + $0x22] sm:$0xff] %v310_v15  ;;  %v326_v16 = vpack.c.bf16 %v310_v15, %v309_v7 }
  0xd4   :  { %v584_v36 = vpop.f32.mrf.mxu0 }
  0xd5   :  { %491 = vmatmul.bf16.gmra.mxu3 %v326_v16  ;;  %v585_v42 = vadd.f32 %v1417_v39, %v584_v36 }
  0xd6   :  { %965 = vmatpush.bf16.msra.mxu0 %v1381_v21  ;;  %1395 = vmatpush.bf16.msra.mxu1 %v1381_v21 }
  0xda   :  { %v318_v18 = vld [vmem:[#allocation3 + $0x21] sm:$0xff]  ;;  %966 = vmatpush.bf16.msra.mxu0 %v1380_v23  ;;  %1396 = vmatpush.bf16.msra.mxu1 %v1380_v23 }
  0xdb   :  { %v325_v19 = vpack.c.bf16 %v318_v18, %v317_v17 }
  0xdc   :  { %v586_v45 = vpop.f32.mrf.mxu0 }
  0xdd   :  { %472 = vmatmul.bf16.gmra.mxu2 %v325_v19  ;;  %v587_v52 = vadd.f32 %v1417_v39, %v586_v45 }
  0xde   :  { %967 = vmatpush.bf16.msra.mxu0 %v1379_v25  ;;  %1397 = vmatpush.bf16.msra.mxu1 %v1379_v25 }
  0xe2   :  { %968 = vmatpush.bf16.msra.mxu0 %v1378_v27  ;;  %1398 = vmatpush.bf16.msra.mxu1 %v1378_v27 }
  0xe4   :  { %v589_v57 = vpop.f32.mrf.mxu0 }
  0xe5   :  { %v590_v62 = vadd.f32 %v1417_v39, %v589_v57 }
  0xe6   :  { %969 = vmatpush.bf16.msra.mxu0 %v1377_v29  ;;  %1399 = vmatpush.bf16.msra.mxu1 %v1377_v29 }
  0xea   :  { %970 = vmatpush.bf16.msra.mxu0 %v1376_v31  ;;  %1400 = vmatpush.bf16.msra.mxu1 %v1376_v31 }
  0xec   :  { %v591_v6 = vpop.f32.mrf.mxu0 }
  0xed   :  { %v592_v12 = vadd.f32 %v1417_v39, %v591_v6 }
 0x148   :  { %v487_v37 = vpop.f32.mrf.mxu3 }
 0x150   :  { %v468_v40 = vpop.f32.mrf.mxu2  ;;  %v489_v46 = vpop.f32.mrf.mxu3 }
 0x151   :  { %v469_v41 = vadd.f32 %v1418_v38, %v468_v40 }
 0x153   :  { %v488_v43 = vadd.f32 %v487_v37, %v469_v41 }
 0x155   :  { %v497_v44 = vmax.f32 %v488_v43, 0.0 }
 0x157   :  { %v594_v47 = vadd.f32 %v585_v42, %v497_v44 }
 0x158   :  { %v470_v48 = vpop.f32.mrf.mxu2  ;;  %v492_v59 = vpop.f32.mrf.mxu3 }
 0x159   :  { %v1659_v49 = vmax.f32 %v594_v47, 0.0  ;;  %v471_v50 = vadd.f32 %v1418_v38, %v470_v48 }
 0x15b   :  { %602 = vst [vmem:[#allocation2 + $0x2] sm:$0xff] %v1659_v49  ;;  %v490_v51 = vadd.f32 %v489_v46, %v471_v50 }
 0x15d   :  { %v498_v53 = vmax.f32 %v490_v51, 0.0 }
 0x15f   :  { %v595_v56 = vadd.f32 %v587_v52, %v498_v53 }
 0x160   :  { %v473_v58 = vpop.f32.mrf.mxu2  ;;  %v494_v7 = vpop.f32.mrf.mxu3 }
 0x161   :  { %v1662_v60 = vmax.f32 %v595_v56, 0.0  ;;  %v474_v61 = vadd.f32 %v1418_v38, %v473_v58 }
 0x162   :  { %v606_v8 = vld [vmem:[#allocation2] sm:$0xff] }
 0x163   :  { %603 = vst [vmem:[#allocation2 + $0xa] sm:$0xff] %v1662_v60  ;;  %v493_v63 = vadd.f32 %v492_v59, %v474_v61  ;;  %v615_v0 = vpack.c.bf16 %v1662_v60, %v1659_v49 }
 0x165   :  { %v499_v1 = vmax.f32 %v493_v63, 0.0  ;;  %779 = vmatmul.bf16.vlgmr.msrb.gmra.mxu2 %v615_v0 }
 0x167   :  { %v596_v2 = vadd.f32 %v590_v62, %v499_v1  ;;  %v1420_v1 = vld [vmem:[%s1689_s4 + $0x1] ss:$0 sm:$0xff]  ;;  %s1583_s4 = smov [#allocation13]  }
 0x168   :  { %v475_v3 = vpop.f32.mrf.mxu2  ;;  %s1006_s30 = sshll.u32 %s1583_s4, 4  ;;  %s1007_s30 = int_to_ptr.vmem [resolvable:$true] %s1006_s30 }
 0x169   :  { %v1667_v4 = vmax.f32 %v596_v2, 0.0  ;;  %v476_v5 = vadd.f32 %v1418_v38, %v475_v3 }
 0x16a   :  { %v607_v9 = vld [vmem:[#allocation2 + $0x8] sm:$0xff] }
 0x16b   :  { %604 = vst [vmem:[#allocation2 + $0x1a] sm:$0xff] %v1667_v4  ;;  %v495_v10 = vadd.f32 %v494_v7, %v476_v5  ;;  %v614_v11 = vpack.c.bf16 %v607_v9, %v606_v8 }
 0x16d   :  { %v500_v13 = vmax.f32 %v495_v10, 0.0  ;;  %760 = vmatmul.bf16.vlgmr.msrb.gmra.mxu1 %v614_v11 }
 0x16f   :  { %v597_v14 = vadd.f32 %v592_v12, %v500_v13 }
 0x171   :  { %v1670_v15 = vmax.f32 %v597_v14, 0.0 }
 0x172   :  { %v608_v17 = vld [vmem:[#allocation2 + $0x18] sm:$0xff] }
 0x173   :  { %605 = vst [vmem:[#allocation2 + $0x22] sm:$0xff] %v1670_v15  ;;  %v617_v16 = vpack.c.bf16 %v1670_v15, %v1667_v4 }
 0x175   :  { %784 = vmatmul.bf16.gmra.mxu2 %v617_v16 }
 0x17a   :  { %v609_v18 = vld [vmem:[#allocation2 + $0x20] sm:$0xff] }
 0x17b   :  { %v616_v19 = vpack.c.bf16 %v609_v18, %v608_v17 }
 0x17d   :  { %765 = vmatmul.bf16.gmra.mxu1 %v616_v19 }
 0x1e8   :  { %v780_v35 = vpop.f32.mrf.mxu2 }
 0x1ea   :  { %v761_v36 = vpop.f32.mrf.mxu1 }
 0x1eb   :  { %v762_v37 = vadd.f32 %v1419_v34, %v761_v36 }
 0x1ed   :  { %v781_v38 = vadd.f32 %v780_v35, %v762_v37 }
 0x1ef   :  { %v790_v39 = vmax.f32 %v781_v38, 0.0 }
 0x1f0   :  { %v782_v40 = vpop.f32.mrf.mxu2 }
 0x1f1   :  { %794 = vst [vmem:[#allocation3 + $0x2] sm:$0xff] %v790_v39 }
 0x1f2   :  { %v763_v41 = vpop.f32.mrf.mxu1 }
 0x1f3   :  { %v764_v42 = vadd.f32 %v1419_v34, %v763_v41 }
 0x1f5   :  { %v783_v43 = vadd.f32 %v782_v40, %v764_v42 }
 0x1f7   :  { %v791_v44 = vmax.f32 %v783_v43, 0.0 }
 0x1f8   :  { %v785_v47 = vpop.f32.mrf.mxu2  ;;  %v798_v52 = vld [vmem:[#allocation3] sm:$0xff] }
 0x1f9   :  { %795 = vst [vmem:[#allocation3 + $0xa] sm:$0xff] %v791_v44  ;;  %v807_v45 = vpack.c.bf16 %v791_v44, %v790_v39 }
 0x1fa   :  { %v766_v46 = vpop.f32.mrf.mxu1 }
 0x1fb   :  { %v767_v48 = vadd.f32 %v1419_v34, %v766_v46  ;;  %971 = vmatmul.bf16.vlgmr.msra.gmra.mxu0 %v807_v45 }
 0x1fd   :  { %v786_v50 = vadd.f32 %v785_v47, %v767_v48 }
 0x1ff   :  { %v792_v51 = vmax.f32 %v786_v50, 0.0 }
 0x200   :  { %v799_v53 = vld [vmem:[#allocation3 + $0x8] sm:$0xff]  ;;  %v787_v57 = vpop.f32.mrf.mxu2 }
 0x201   :  { %796 = vst [vmem:[#allocation3 + $0x1a] sm:$0xff] %v792_v51  ;;  %v806_v54 = vpack.c.bf16 %v799_v53, %v798_v52 }
 0x202   :  { %v768_v55 = vpop.f32.mrf.mxu1 }
 0x203   :  { %v769_v56 = vadd.f32 %v1419_v34, %v768_v55  ;;  %952 = vmatmul.bf16.vlgmr.msrb.gmra.mxu3 %v806_v54 }
 0x205   :  { %v788_v58 = vadd.f32 %v787_v57, %v769_v56 }
 0x207   :  { %v793_v59 = vmax.f32 %v788_v58, 0.0 }
 0x208   :  { %v800_v62 = vld [vmem:[#allocation3 + $0x18] sm:$0xff] }
 0x209   :  { %797 = vst [vmem:[#allocation3 + $0x22] sm:$0xff] %v793_v59  ;;  %v809_v61 = vpack.c.bf16 %v793_v59, %v792_v51 }
 0x20b   :  { %976 = vmatmul.bf16.vlgmr.msra.gmra.mxu1 %v809_v61 }
 0x210   :  { %v801_v63 = vld [vmem:[#allocation3 + $0x20] sm:$0xff] }
 0x211   :  { %v808_v0 = vpack.c.bf16 %v801_v63, %v800_v62 }
 0x213   :  { %957 = vmatmul.bf16.gmra.mxu3 %v808_v0 }
 0x278   :  { %v972_v2 = vpop.f32.mrf.mxu0 }
 0x280   :  { %v974_v12 = vpop.f32.mrf.mxu0 }
 0x286   :  { %v953_v3 = vpop.f32.mrf.mxu3 }
 0x287   :  { %v954_v5 = vadd.f32 %v1420_v1, %v953_v3 }
 0x288   :  { %v977_v17 = vpop.f32.mrf.mxu1 }
 0x289   :  { %v973_v6 = vadd.f32 %v972_v2, %v954_v5 }
 0x28b   :  { %v982_v7 = vmax.f32 %v973_v6, 0.0 }
 0x28d   :  { %v990_v8 = vadd.f32 %v982_v7, %v1659_v49 }
 0x28e   :  { %v955_v9 = vpop.f32.mrf.mxu3 }
 0x28f   :  { %v994_v10 = vmax.f32 %v990_v8, 0.0  ;;  %v956_v11 = vadd.f32 %v1420_v1, %v955_v9 }
 0x290   :  { %v979_v26 = vpop.f32.mrf.mxu1 }
 0x291   :  { %998 = vst [vmem:[#allocation13] sm:$0xff] %v994_v10  ;;  %v975_v13 = vadd.f32 %v974_v12, %v956_v11 }
 0x293   :  { %v983_v14 = vmax.f32 %v975_v13, 0.0 }
 0x295   :  { %v991_v16 = vadd.f32 %v983_v14, %v1662_v60 }
 0x296   :  { %v958_v18 = vpop.f32.mrf.mxu3 }
 0x297   :  { %v995_v19 = vmax.f32 %v991_v16, 0.0  ;;  %v959_v20 = vadd.f32 %v1420_v1, %v958_v18 }
 0x299   :  { %999 = vst [vmem:[#allocation13 + $0x8] sm:$0xff] %v995_v19  ;;  %v978_v21 = vadd.f32 %v977_v17, %v959_v20 }
 0x29b   :  { %v984_v22 = vmax.f32 %v978_v21, 0.0 }
 0x29d   :  { %v992_v23 = vadd.f32 %v984_v22, %v1667_v4 }
 0x29e   :  { %v960_v24 = vpop.f32.mrf.mxu3 }
 0x29f   :  { %v996_v49 = vmax.f32 %v992_v23, 0.0  ;;  %v961_v25 = vadd.f32 %v1420_v1, %v960_v24 }
 0x2a1   :  { %1000 = vst [vmem:[#allocation13 + $0x10] sm:$0xff] %v996_v49  ;;  %v980_v27 = vadd.f32 %v979_v26, %v961_v25 }
 0x2a3   :  { %v985_v28 = vmax.f32 %v980_v27, 0.0 }
 0x2a5   :  { %v993_v60 = vadd.f32 %v985_v28, %v1670_v15 }
 0x2a7   :  { %v997_v29 = vmax.f32 %v993_v60, 0.0 }
 0x2a9   :  { %1001 = vst [vmem:[#allocation13 + $0x18] sm:$0xff] %v997_v29 }
 0x2aa   :  { %1014 = dma.vmem_to_hbm [thread:$0]  %s1007_s30, 512, %s1009_s10, [#allocation6], %s1584_s11, %s1584_s11, %s1585_s12  }
 0x2ab   :  { %1571 = dma.done.wait [#allocation6], 512  }
 0x2ac   :  { %1572 = vsyncadd [#allocation6], 4294966784 }
 0x2ad   :  { %1019 = vsyncpa [#allocation5], 1 }
 0x2ae   :  { %1020 = vsyncpa [#allocation8], 1 }
 0x2af   :  { %1021 = vsyncpa [#allocation11], 1 }
 0x2b0   :  { %1022 = vsyncpa [#allocation6], 1 }

</bundles_post_ra>
